<compile_context>
chip_gen: v7x
topology: tpu7x:2x2x1
jax: 0.10.0
libtpu: 0.0.40
codegen_flags: <defaults>
</compile_context>

<pallas_src>
import jax
import jax.numpy as jnp
from jax.experimental import pallas as pl
from jax.experimental.pallas import tpu as pltpu


def _round_up(x: int, m: int) -> int:
    return (x + m - 1) // m * m


# ---------------------------------------------------------------------------
# Kernel
# ---------------------------------------------------------------------------
def _ocr_kernel(chars_ref, pos_ref, w1_ref, w24_ref, small_ref, out_ref,
                t_sc, p_sc):
    # chars_ref : [TILE_N, Hp]  f32   (char codes, zero-padded lanes)
    # pos_ref   : [TILE_N, 128] f32   (box feats in lanes 0..3, rest zero)
    # w1_ref    : [Hp, Hp]            resident, single-buffered
    # w24_ref   : [2*Hp, TILE_H]      rows [0:Hp]=w2 cols, [Hp:2Hp]=w4 cols
    # small_ref : [8, Hp]   f32       rows 0..3 = w3, 4 = b1, 5 = b3, 6 = b2+b4
    # out_ref   : [TILE_N, TILE_H]
    # t_sc,p_sc : [TILE_N, Hp] scratch (mxu dtype), persist across column steps
    j = pl.program_id(1)
    hp = w1_ref.shape[0]
    th = out_ref.shape[1]

    # Layer 1 (both branches) only once per row tile; reuse across column tiles.
    @pl.when(j == 0)
    def _():
        b1 = small_ref[4:5, :]
        b3 = small_ref[5:6, :]

        # Text branch layer 1 on the MXU (f32 accumulate).
        x = chars_ref[...].astype(w1_ref.dtype)
        t = jnp.dot(x, w1_ref[...], preferred_element_type=jnp.float32)
        t_sc[...] = jnp.maximum(t + b1, 0.0).astype(t_sc.dtype)   # ReLU; Dropout=identity

        # Position branch layer 1 (K=4) on the VPU: balanced FMA tree.
        pos = pos_ref[...]
        a01 = pos[:, 0:1] * small_ref[0:1, :] + pos[:, 1:2] * small_ref[1:2, :]
        a23 = pos[:, 2:3] * small_ref[2:3, :] + pos[:, 3:4] * small_ref[3:4, :]
        p_sc[...] = jnp.maximum(a01 + a23 + b3, 0.0).astype(p_sc.dtype)

    # Layer 2: two dots into one f32 accumulator (no concat copy).
    col0 = pl.multiple_of(j * th, 128)
    b24 = small_ref[6:7, pl.ds(col0, th)]
    o = jnp.dot(t_sc[...], w24_ref[0:hp, :], preferred_element_type=jnp.float32)
    o = o + jnp.dot(p_sc[...], w24_ref[hp:2 * hp, :],
                    preferred_element_type=jnp.float32)
    out_ref[...] = (o + b24).astype(out_ref.dtype)


# ---------------------------------------------------------------------------
# VMEM budgeting (conservative budget fits v7x's 64 MiB physical VMEM)
# ---------------------------------------------------------------------------
def _vmem_bytes(hp, tile, tile_h, nc, wbytes):
    f32b = 4
    w1 = hp * hp * wbytes                                # single-buffered
    w24 = 2 * hp * tile_h * wbytes * (1 if nc == 1 else 2)
    small = 8 * hp * f32b
    chars = 2 * tile * hp * f32b                         # double-buffered
    pos = 2 * tile * 128 * f32b
    out = 2 * tile * tile_h * f32b
    scratch = 2 * tile * hp * wbytes                     # t_sc + p_sc
    return w1 + w24 + small + chars + pos + out + scratch


def _choose_tile_h(hp, tile, wbytes, budget):
    for tile_h in range(hp, 0, -128):
        if hp % tile_h:
            continue
        nc = hp // tile_h
        if _vmem_bytes(hp, tile, tile_h, nc, wbytes) <= budget:
            return tile_h, nc
    return None


# ---------------------------------------------------------------------------
# Parameter packing (hoist out of the per-call path; do once per model)
# ---------------------------------------------------------------------------
def pack_ocr_params(params, *, mxu_dtype=jnp.float32):
    """Pack (w1,b1,w2,b2,w3,b3,w4,b4) into lane-dense resident slabs."""
    w1, b1, w2, b2, w3, b3, w4, b4 = params
    h = w1.shape[0]
    hp = max(128, _round_up(h, 128))
    f32 = jnp.float32

    def pad_hh(w):  # [H, H] -> [Hp, Hp]; zero padding keeps padded lanes at 0
        return jnp.zeros((hp, hp), f32).at[:h, :h].set(w.astype(f32))

    w1_p = pad_hh(w1).astype(mxu_dtype)
    # Column-tileable layer-2 slab: rows [0:Hp] = w2, rows [Hp:2Hp] = w4.
    w24_p = jnp.concatenate([pad_hh(w2), pad_hh(w4)], axis=0).astype(mxu_dtype)

    # Small-parameter slab (always f32): w3 rows, b1, b3, b2+b4.
    small = jnp.zeros((8, hp), f32)
    small = small.at[0:4, :h].set(w3.astype(f32))
    small = small.at[4, :h].set(b1.astype(f32))
    small = small.at[5, :h].set(b3.astype(f32))
    small = small.at[6, :h].set((b2 + b4).astype(f32))

    return {"w1": w1_p, "w24": w24_p, "small": small, "h": h, "hp": hp}


# ---------------------------------------------------------------------------
# Wrapper
# ---------------------------------------------------------------------------
def ocr_feature_extractor(char_ids, box_feats, packed, *, tile_n=512,
                          vmem_budget_bytes=44 * 1024 * 1024):
    """char_ids: [N, H] f32, box_feats: [N, 4] f32 -> [N, H] f32."""
    n, h_in = char_ids.shape
    h, hp = packed["h"], packed["hp"]
    assert h_in == h, f"char_ids feature dim {h_in} != packed hidden_dim {h}"
    f32 = jnp.float32
    wbytes = packed["w1"].dtype.itemsize

    # Row tiling: sublane-aligned; keep >=2 grid steps along rows when
    # possible so ("parallel", ...) can shard across both v7x TensorCores.
    n8 = _round_up(max(n, 1), 8)
    tile = min(tile_n, n8)
    if n8 > 8:
        tile = min(tile, _round_up(-(-n8 // 2), 8))

    # Column tiling of the layer-2 weights so the resident footprint fits the
    # VMEM budget (44 MiB default: safe for v7x's 64 MiB physical / raised
    # scoped limit; v5e/v6e have 128 MiB physical). Shrink the row tile as a
    # fallback, and fail loudly if even minimal tiling cannot fit.
    while True:
        sel = _choose_tile_h(hp, tile, wbytes, vmem_budget_bytes)
        if sel is not None:
            tile_h, nc = sel
            break
        if tile <= 8:
            raise ValueError(
                f"hidden_dim={h} (padded to {hp}) does not fit the VMEM budget "
                f"of {vmem_budget_bytes} bytes even with minimal tiling; use "
                f"bf16 weights, reduce hidden_dim, or raise vmem_budget_bytes.")
        tile = max(8, _round_up(tile // 2, 8))

    n_pad = _round_up(n8, tile)

    # Skip the wrapper-side padding copy when it is a no-op.
    if n == n_pad and h == hp and char_ids.dtype == f32:
        chars_p = char_ids
    else:
        chars_p = jnp.zeros((n_pad, hp), f32).at[:n, :h].set(char_ids.astype(f32))
    # Box features padded to a full 128-lane block (lane-dense DMA).
    pos_p = jnp.zeros((n_pad, 128), f32).at[:n, :4].set(box_feats.astype(f32))

    need = _vmem_bytes(hp, tile, tile_h, nc, wbytes)
    vmem_limit = int(min(max(need * 5 // 4 + (4 << 20), 32 << 20), 60 << 20))

    # w2|w4 slab: constant across the grid when nc == 1 -> single-buffer it;
    # otherwise keep default double-buffering so the next column block's DMA
    # overlaps with compute.
    if nc == 1:
        w24_spec = pl.BlockSpec((2 * hp, tile_h), lambda i, j: (0, j),
                                pipeline_mode=pl.Buffered(1))
    else:
        w24_spec = pl.BlockSpec((2 * hp, tile_h), lambda i, j: (0, j))

    grid = (n_pad // tile, nc)
    out = pl.pallas_call(
        _ocr_kernel,
        out_shape=jax.ShapeDtypeStruct((n_pad, hp), f32),
        grid=grid,
        in_specs=[
            pl.BlockSpec((tile, hp), lambda i, j: (i, 0)),      # char ids
            pl.BlockSpec((tile, 128), lambda i, j: (i, 0)),     # box feats
            pl.BlockSpec((hp, hp), lambda i, j: (0, 0),         # w1 (resident)
                         pipeline_mode=pl.Buffered(1)),
            w24_spec,                                           # w2|w4 columns
            pl.BlockSpec((8, hp), lambda i, j: (0, 0),          # w3/b1/b3/b2+b4
                         pipeline_mode=pl.Buffered(1)),
        ],
        out_specs=pl.BlockSpec((tile, tile_h), lambda i, j: (i, j)),
        scratch_shapes=[
            pltpu.VMEM((tile, hp), packed["w1"].dtype),   # t = relu(x@w1+b1)
            pltpu.VMEM((tile, hp), packed["w1"].dtype),   # p = relu(box@w3+b3)
        ],
        compiler_params=pltpu.CompilerParams(
            dimension_semantics=("parallel", "arbitrary"),
            vmem_limit_bytes=vmem_limit),
    )(chars_p, pos_p, packed["w1"], packed["w24"], packed["small"])

    if n_pad == n and hp == h:
        return out
    return out[:n, :h]


# ---------------------------------------------------------------------------
# Parameters / reference
# ---------------------------------------------------------------------------
def init_params(hidden_dim, key):
    """Deterministic parameter init (shapes match the nn.Module's __init__)."""
    ks = jax.random.split(key, 8)
    scale_h = 1.0 / jnp.sqrt(hidden_dim)
    scale_4 = 1.0 / jnp.sqrt(4.0)
    # Stored as [in, out] (transposed vs. PyTorch's [out, in]).
    w1 = jax.random.uniform(ks[0], (hidden_dim, hidden_dim), jnp.float32, -scale_h, scale_h)
    b1 = jax.random.uniform(ks[1], (hidden_dim,), jnp.float32, -scale_h, scale_h)
    w2 = jax.random.uniform(ks[2], (hidden_dim, hidden_dim), jnp.float32, -scale_h, scale_h)
    b2 = jax.random.uniform(ks[3], (hidden_dim,), jnp.float32, -scale_h, scale_h)
    w3 = jax.random.uniform(ks[4], (4, hidden_dim), jnp.float32, -scale_4, scale_4)
    b3 = jax.random.uniform(ks[5], (hidden_dim,), jnp.float32, -scale_4, scale_4)
    w4 = jax.random.uniform(ks[6], (hidden_dim, hidden_dim), jnp.float32, -scale_h, scale_h)
    b4 = jax.random.uniform(ks[7], (hidden_dim,), jnp.float32, -scale_h, scale_h)
    return (w1, b1, w2, b2, w3, b3, w4, b4)


def reference(char_ids, box_feats, params):
    """Pure-JAX reference for correctness checking."""
    w1, b1, w2, b2, w3, b3, w4, b4 = params
    t = jnp.maximum(char_ids @ w1 + b1, 0.0) @ w2 + b2
    p = jnp.maximum(box_feats @ w3 + b3, 0.0) @ w4 + b4
    return t + p


if __name__ == "__main__":
    key = jax.random.PRNGKey(0)
    k_par, k_char, k_box = jax.random.split(key, 3)

    N = 8           # number of OCR results
    HIDDEN = 32     # hidden_dim (each "text" has exactly HIDDEN characters)

    params = init_params(HIDDEN, k_par)

    # Synthetic "texts": integer char codes in the printable ASCII range.
    # TODO(synk): the Python-side str -> ord() tokenization of the PyTorch
    # module happens on the host; the kernel starts from the numeric codes.
    char_ids = jax.random.randint(k_char, (N, HIDDEN), 32, 127).astype(jnp.float32)

    # Synthetic boxes -> [center_x, center_y, width, height] per result.
    corners = jax.random.uniform(k_box, (N, 4), jnp.float32, 0.0, 100.0)
    x1 = jnp.minimum(corners[:, 0], corners[:, 2])
    x2 = jnp.maximum(corners[:, 0], corners[:, 2])
    y1 = jnp.minimum(corners[:, 1], corners[:, 3])
    y2 = jnp.maximum(corners[:, 1], corners[:, 3])
    box_feats = jnp.stack([(x1 + x2) / 2, (y1 + y2) / 2, x2 - x1, y2 - y1], axis=-1)

    ref = reference(char_ids, box_feats, params)

    # --- f32 MXU path (default, numerically exact restructuring) ---
    packed = pack_ocr_params(params)                      # pack once per model
    out = jax.block_until_ready(ocr_feature_extractor(char_ids, box_feats, packed))
    assert out.shape == (N, HIDDEN)
    err = jnp.max(jnp.abs(out - ref)) / jnp.maximum(jnp.max(jnp.abs(ref)), 1.0)
    assert float(err) < 1e-5, f"f32 path mismatch vs reference, rel err={float(err)}"

    # --- bf16 MXU-operand path (v6e/v7x throughput option; f32 accumulate) ---
    packed_bf16 = pack_ocr_params(params, mxu_dtype=jnp.bfloat16)
    out_bf = jax.block_until_ready(ocr_feature_extractor(char_ids, box_feats, packed_bf16))
    err_bf = jnp.max(jnp.abs(out_bf - ref)) / jnp.maximum(jnp.max(jnp.abs(ref)), 1.0)
    assert float(err_bf) < 3e-2, f"bf16 path mismatch vs reference, rel err={float(err_bf)}"

    print("KERNEL_OK")
</pallas_src>

<mosaic_0001>
module attributes {stable_mosaic.version = 11 : i64} {
  func.func @_ocr_kernel(%arg0: i32, %arg1: i32, %arg2: memref<8x128xf32, #tpu.memory_space<vmem>>, %arg3: memref<8x128xf32, #tpu.memory_space<vmem>>, %arg4: memref<128x128xf32, #tpu.memory_space<vmem>>, %arg5: memref<256x128xf32, #tpu.memory_space<vmem>>, %arg6: memref<8x128xf32, #tpu.memory_space<vmem>>, %arg7: memref<8x128xf32, #tpu.memory_space<vmem>>, %arg8: memref<8x128xf32, #tpu.memory_space<vmem>>, %arg9: memref<8x128xf32, #tpu.memory_space<vmem>>) attributes {dimension_semantics = [#tpu.dimension_semantics<parallel>, #tpu.dimension_semantics<arbitrary>], iteration_bounds = array<i64: 1, 1>, scalar_prefetch = 0 : i64, scratch_operands = 2 : i64, tpu.core_type = #tpu.core_type<tc>, window_params = [{transform_indices = @transform_0, window_bounds = array<i64: 8, 128>}, {transform_indices = @transform_1, window_bounds = array<i64: 8, 128>}, {pipeline_mode = #tpu.pipeline_mode<synchronous>, transform_indices = @transform_2, window_bounds = array<i64: 128, 128>}, {pipeline_mode = #tpu.pipeline_mode<synchronous>, transform_indices = @transform_3, window_bounds = array<i64: 256, 128>}, {pipeline_mode = #tpu.pipeline_mode<synchronous>, transform_indices = @transform_4, window_bounds = array<i64: 8, 128>}, {transform_indices = @transform_5, window_bounds = array<i64: 8, 128>}]} {
    %c0_i32 = arith.constant 0 : i32
    %0 = arith.cmpi eq, %arg1, %c0_i32 : i32
    %1 = arith.extui %0 : i1 to i32
    %c0_i32_0 = arith.constant 0 : i32
    %2 = arith.cmpi ne, %1, %c0_i32_0 : i32
    scf.if %2 {
      %c4 = arith.constant 4 : index
      %c0_10 = arith.constant 0 : index
      %17 = vector.load %arg6[%c4, %c0_10] : memref<8x128xf32, #tpu.memory_space<vmem>>, vector<1x128xf32>
      %c5 = arith.constant 5 : index
      %c0_11 = arith.constant 0 : index
      %18 = vector.load %arg6[%c5, %c0_11] : memref<8x128xf32, #tpu.memory_space<vmem>>, vector<1x128xf32>
      %c0_12 = arith.constant 0 : index
      %c0_13 = arith.constant 0 : index
      %19 = vector.load %arg2[%c0_12, %c0_13] : memref<8x128xf32, #tpu.memory_space<vmem>>, vector<8x128xf32>
      %c0_14 = arith.constant 0 : index
      %c0_15 = arith.constant 0 : index
      %20 = vector.load %arg4[%c0_14, %c0_15] : memref<128x128xf32, #tpu.memory_space<vmem>>, vector<128x128xf32>
      %cst_16 = arith.constant dense<0.000000e+00> : vector<8x128xf32>
      %21 = tpu.matmul %19, %20, %cst_16 {dimension_numbers = #tpu.dot_dimension_numbers<[1], [0], [0], [1], [0, 0, 1, 1], [], []>} : vector<8x128xf32>, vector<128x128xf32>, vector<8x128xf32> -> vector<8x128xf32>
      %22 = vector.broadcast %17 : vector<1x128xf32> to vector<8x128xf32>
      %23 = arith.addf %21, %22 : vector<8x128xf32>
      %cst_17 = arith.constant 0.000000e+00 : f32
      %24 = vector.broadcast %cst_17 : f32 to vector<8x128xf32>
      %25 = arith.maximumf %23, %24 : vector<8x128xf32>
      %c0_18 = arith.constant 0 : index
      %c0_19 = arith.constant 0 : index
      %26 = vector.load %arg8[%c0_18, %c0_19] : memref<8x128xf32, #tpu.memory_space<vmem>>, vector<8x128xf32>
      tpu.vector_store %arg8[%c0_18, %c0_19], %25 {strides = array<i32>} : memref<8x128xf32, #tpu.memory_space<vmem>>, vector<8x128xf32>,
      %c0_20 = arith.constant 0 : index
      %c0_21 = arith.constant 0 : index
      %27 = vector.load %arg3[%c0_20, %c0_21] : memref<8x128xf32, #tpu.memory_space<vmem>>, vector<8x128xf32>
      %28 = vector.extract_strided_slice %27 {offsets = [0, 0], sizes = [8, 1], strides = [1, 1]} : vector<8x128xf32> to vector<8x1xf32>
      %c0_22 = arith.constant 0 : index
      %c0_23 = arith.constant 0 : index
      %29 = vector.load %arg6[%c0_22, %c0_23] : memref<8x128xf32, #tpu.memory_space<vmem>>, vector<1x128xf32>
      %30 = vector.broadcast %28 : vector<8x1xf32> to vector<8x128xf32>
      %31 = vector.broadcast %29 : vector<1x128xf32> to vector<8x128xf32>
      %32 = arith.mulf %30, %31 : vector<8x128xf32>
      %33 = vector.extract_strided_slice %27 {offsets = [0, 1], sizes = [8, 1], strides = [1, 1]} : vector<8x128xf32> to vector<8x1xf32>
      %c1 = arith.constant 1 : index
      %c0_24 = arith.constant 0 : index
      %34 = vector.load %arg6[%c1, %c0_24] : memref<8x128xf32, #tpu.memory_space<vmem>>, vector<1x128xf32>
      %35 = vector.broadcast %33 : vector<8x1xf32> to vector<8x128xf32>
      %36 = vector.broadcast %34 : vector<1x128xf32> to vector<8x128xf32>
      %37 = arith.mulf %35, %36 : vector<8x128xf32>
      %38 = arith.addf %32, %37 : vector<8x128xf32>
      %39 = vector.extract_strided_slice %27 {offsets = [0, 2], sizes = [8, 1], strides = [1, 1]} : vector<8x128xf32> to vector<8x1xf32>
      %c2 = arith.constant 2 : index
      %c0_25 = arith.constant 0 : index
      %40 = vector.load %arg6[%c2, %c0_25] : memref<8x128xf32, #tpu.memory_space<vmem>>, vector<1x128xf32>
      %41 = vector.broadcast %39 : vector<8x1xf32> to vector<8x128xf32>
      %42 = vector.broadcast %40 : vector<1x128xf32> to vector<8x128xf32>
      %43 = arith.mulf %41, %42 : vector<8x128xf32>
      %44 = vector.extract_strided_slice %27 {offsets = [0, 3], sizes = [8, 1], strides = [1, 1]} : vector<8x128xf32> to vector<8x1xf32>
      %c3 = arith.constant 3 : index
      %c0_26 = arith.constant 0 : index
      %45 = vector.load %arg6[%c3, %c0_26] : memref<8x128xf32, #tpu.memory_space<vmem>>, vector<1x128xf32>
      %46 = vector.broadcast %44 : vector<8x1xf32> to vector<8x128xf32>
      %47 = vector.broadcast %45 : vector<1x128xf32> to vector<8x128xf32>
      %48 = arith.mulf %46, %47 : vector<8x128xf32>
      %49 = arith.addf %43, %48 : vector<8x128xf32>
      %50 = arith.addf %38, %49 : vector<8x128xf32>
      %51 = vector.broadcast %18 : vector<1x128xf32> to vector<8x128xf32>
      %52 = arith.addf %50, %51 : vector<8x128xf32>
      %cst_27 = arith.constant 0.000000e+00 : f32
      %53 = vector.broadcast %cst_27 : f32 to vector<8x128xf32>
      %54 = arith.maximumf %52, %53 : vector<8x128xf32>
      %c0_28 = arith.constant 0 : index
      %c0_29 = arith.constant 0 : index
      %55 = vector.load %arg9[%c0_28, %c0_29] : memref<8x128xf32, #tpu.memory_space<vmem>>, vector<8x128xf32>
      tpu.vector_store %arg9[%c0_28, %c0_29], %54 {strides = array<i32>} : memref<8x128xf32, #tpu.memory_space<vmem>>, vector<8x128xf32>,
    } else {
    }
    %c128_i32 = arith.constant 128 : i32
    %3 = arith.muli %arg1, %c128_i32 : i32
    %4 = tpu.assume_multiple %3, 128 : i32
    %c6 = arith.constant 6 : index
    %5 = arith.index_cast %4 : i32 to index
    %6 = vector.load %arg6[%c6, %5] : memref<8x128xf32, #tpu.memory_space<vmem>>, vector<1x128xf32>
    %c0 = arith.constant 0 : index
    %c0_1 = arith.constant 0 : index
    %7 = vector.load %arg8[%c0, %c0_1] : memref<8x128xf32, #tpu.memory_space<vmem>>, vector<8x128xf32>
    %c0_2 = arith.constant 0 : index
    %c0_3 = arith.constant 0 : index
    %8 = vector.load %arg5[%c0_2, %c0_3] : memref<256x128xf32, #tpu.memory_space<vmem>>, vector<128x128xf32>
    %cst = arith.constant dense<0.000000e+00> : vector<8x128xf32>
    %9 = tpu.matmul %7, %8, %cst {dimension_numbers = #tpu.dot_dimension_numbers<[1], [0], [0], [1], [0, 0, 1, 1], [], []>} : vector<8x128xf32>, vector<128x128xf32>, vector<8x128xf32> -> vector<8x128xf32>
    %c0_4 = arith.constant 0 : index
    %c0_5 = arith.constant 0 : index
    %10 = vector.load %arg9[%c0_4, %c0_5] : memref<8x128xf32, #tpu.memory_space<vmem>>, vector<8x128xf32>
    %c128 = arith.constant 128 : index
    %c0_6 = arith.constant 0 : index
    %11 = vector.load %arg5[%c128, %c0_6] : memref<256x128xf32, #tpu.memory_space<vmem>>, vector<128x128xf32>
    %cst_7 = arith.constant dense<0.000000e+00> : vector<8x128xf32>
    %12 = tpu.matmul %10, %11, %cst_7 {dimension_numbers = #tpu.dot_dimension_numbers<[1], [0], [0], [1], [0, 0, 1, 1], [], []>} : vector<8x128xf32>, vector<128x128xf32>, vector<8x128xf32> -> vector<8x128xf32>
    %13 = arith.addf %9, %12 : vector<8x128xf32>
    %14 = vector.broadcast %6 : vector<1x128xf32> to vector<8x128xf32>
    %15 = arith.addf %13, %14 : vector<8x128xf32>
    %c0_8 = arith.constant 0 : index
    %c0_9 = arith.constant 0 : index
    %16 = vector.load %arg7[%c0_8, %c0_9] : memref<8x128xf32, #tpu.memory_space<vmem>>, vector<8x128xf32>
    tpu.vector_store %arg7[%c0_8, %c0_9], %15 {strides = array<i32>} : memref<8x128xf32, #tpu.memory_space<vmem>>, vector<8x128xf32>,
    return
  }
  func.func @transform_0(%arg0: i32, %arg1: i32) -> (i32, i32) {
    %c0_i32 = arith.constant 0 : i32
    %c0_i32_0 = arith.constant 0 : i32
    return %arg0, %c0_i32 : i32, i32
  }
  func.func @transform_1(%arg0: i32, %arg1: i32) -> (i32, i32) {
    %c0_i32 = arith.constant 0 : i32
    %c0_i32_0 = arith.constant 0 : i32
    return %arg0, %c0_i32 : i32, i32
  }
  func.func @transform_2(%arg0: i32, %arg1: i32) -> (i32, i32) {
    %c0_i32 = arith.constant 0 : i32
    %c0_i32_0 = arith.constant 0 : i32
    %c0_i32_1 = arith.constant 0 : i32
    return %c0_i32, %c0_i32_0 : i32, i32
  }
  func.func @transform_3(%arg0: i32, %arg1: i32) -> (i32, i32) {
    %c0_i32 = arith.constant 0 : i32
    %c0_i32_0 = arith.constant 0 : i32
    return %c0_i32, %arg1 : i32, i32
  }
  func.func @transform_4(%arg0: i32, %arg1: i32) -> (i32, i32) {
    %c0_i32 = arith.constant 0 : i32
    %c0_i32_0 = arith.constant 0 : i32
    %c0_i32_1 = arith.constant 0 : i32
    return %c0_i32, %c0_i32_0 : i32, i32
  }
  func.func @transform_5(%arg0: i32, %arg1: i32) -> (i32, i32) {
    %c0_i32 = arith.constant 0 : i32
    return %arg0, %arg1 : i32, i32
  }
}

</mosaic_0001>

<bundles_post_ra>
// kernel: tpu_custom_call.1
= control target key start
LH: loop header
LB: loop body
LE: loop exit
PB: predicated region body
PF: predicated region fallthrough
CT: control target
= control target key end

     0   :  { %10 = vsyncpa [#allocation5], 0  ;;  %s953_s0 = inlined_call_operand.hbm [shape: f32[8,128], index: 0, kind: input, shape index: {}]   ;;  %s954_s1 = inlined_call_operand.hbm [shape: f32[8,128], index: 1, kind: input, shape index: {}]   ;;  %s955_s2 = inlined_call_operand.hbm [shape: f32[128,128], index: 2, kind: input, shape index: {}]   ;;  %s956_s3 = inlined_call_operand.hbm [shape: f32[256,128], index: 3, kind: input, shape index: {}]   ;;  %s957_s4 = inlined_call_operand.vmem [shape: f32[8,128], index: 4, kind: input, shape index: {}]   ;;  %s958_s5 = inlined_call_operand.hbm [shape: f32[8,128], index: 5, kind: output, shape index: {}]  }
   0x1   :  { %11 = vsyncpa [#allocation8], 0 }
   0x2   :  { %12 = vsyncpa [#allocation11], 0 }
   0x3   :  { %13 = vsyncpa [#allocation6], 0  ;;  %s798_s18 = smov [#allocation7]   ;;  %s799_s20 = smov [#allocation4]  }
   0x4   :  { %s30_s19 = sshll.u32 %s798_s18, 4  ;;  %s20_s21 = sshll.u32 %s799_s20, 4  ;;  %s31_s19 = int_to_ptr.vmem [resolvable:$true] %s30_s19  ;;  %s21_s21 = int_to_ptr.vmem [resolvable:$true] %s20_s21 }
   0x5   :  { %s680_s24 = scalar_lea.hbm %s954_s1, 128 }
   0x6   :  { %p681_p0 = scmp.ne.s32.totalorder %s954_s1, %s680_s24  ;;  %p684_p1 = scmp.lt.u32.totalorder %s680_s24, %s954_s1 }
   0x8   :  { %p686_p2 = pnand %p684_p1, %p681_p0 }
   0xa   :  { %689 = shalt.err (!%p686_p2)
}
   0xb   :  { %s690_s29 = scalar_lea.vmem %s31_s19, 128  ;;  %p695_p4 = scmp.lt.s32.totalorder %s31_s19, %s31_s19 }
   0xc   :  { %p691_p3 = scmp.ne.s32.totalorder %s31_s19, %s690_s29  ;;  %p696_p5 = scmp.lt.s32.totalorder %s690_s29, %s690_s29 }
   0xe   :  { %p697_p6 = por %p696_p5, %p695_p4 }
  0x10   :  { %p698_p7 = pnand %p697_p6, %p691_p3 }
  0x12   :  { %701 = shalt.err (!%p698_p7)
}
  0x13   :  { %33 = dma.hbm_to_vmem [thread:$0]  %s954_s1, 128, %s31_s19, [#allocation8]  }
  0x14   :  { %s702_s9 = scalar_lea.hbm %s953_s0, 128 }
  0x15   :  { %p703_p8 = scmp.ne.s32.totalorder %s953_s0, %s702_s9  ;;  %p706_p9 = scmp.lt.u32.totalorder %s702_s9, %s953_s0 }
  0x17   :  { %p708_p10 = pnand %p706_p9, %p703_p8 }
  0x19   :  { %711 = shalt.err (!%p708_p10)
}
  0x1a   :  { %s712_s14 = scalar_lea.vmem %s21_s21, 128  ;;  %p717_p12 = scmp.lt.s32.totalorder %s21_s21, %s21_s21 }
  0x1b   :  { %p713_p11 = scmp.ne.s32.totalorder %s21_s21, %s712_s14  ;;  %p718_p13 = scmp.lt.s32.totalorder %s712_s14, %s712_s14 }
  0x1d   :  { %p719_p0 = por %p718_p13, %p717_p12 }
  0x1f   :  { %p720_p1 = pnand %p719_p0, %p713_p11 }
  0x21   :  { %723 = shalt.err (!%p720_p1)
}
  0x22   :  { %23 = dma.hbm_to_vmem [thread:$0]  %s953_s0, 128, %s21_s21, [#allocation5]  }
  0x23   :  { %s800_s16 = smov [#allocation9]   ;;  %s724_s20 = scalar_lea.hbm %s955_s2, 2048 }
  0x24   :  { %s39_s17 = sshll.u32 %s800_s16, 4  ;;  %p725_p2 = scmp.ne.s32.totalorder %s955_s2, %s724_s20  ;;  %s40_s17 = int_to_ptr.vmem [resolvable:$true] %s39_s17 }
  0x25   :  { %p728_p3 = scmp.lt.u32.totalorder %s724_s20, %s955_s2 }
  0x27   :  { %p730_p4 = pnand %p728_p3, %p725_p2 }
  0x29   :  { %733 = shalt.err (!%p730_p4)
}
  0x2a   :  { %s734_s26 = scalar_lea.vmem %s40_s17, 2048  ;;  %p739_p6 = scmp.lt.s32.totalorder %s40_s17, %s40_s17 }
  0x2b   :  { %p735_p5 = scmp.ne.s32.totalorder %s40_s17, %s734_s26  ;;  %p740_p7 = scmp.lt.s32.totalorder %s734_s26, %s734_s26 }
  0x2d   :  { %p741_p8 = por %p740_p7, %p739_p6 }
  0x2f   :  { %p742_p9 = pnand %p741_p8, %p735_p5 }
  0x31   :  { %745 = shalt.err (!%p742_p9)
}
  0x32   :  { %s801_s0 = smov 128   ;;  %s802_s21 = smov 8  }
  0x33   :  { %45 = dma.hbm_to_vmem [thread:$0]  %s955_s2, 2048, %s40_s17, [#allocation8], %s801_s0, %s801_s0, %s802_s21  }
  0x34   :  { %s803_s29 = smov [#allocation10]   ;;  %s746_s8 = scalar_lea.hbm %s956_s3, 4096 }
  0x35   :  { %s51_s30 = sshll.u32 %s803_s29, 4  ;;  %p747_p10 = scmp.ne.s32.totalorder %s956_s3, %s746_s8  ;;  %s52_s30 = int_to_ptr.vmem [resolvable:$true] %s51_s30 }
  0x36   :  { %p750_p11 = scmp.lt.u32.totalorder %s746_s8, %s956_s3 }
  0x38   :  { %p752_p12 = pnand %p750_p11, %p747_p10 }
  0x3a   :  { %755 = shalt.err (!%p752_p12)
}
  0x3b   :  { %s756_s13 = scalar_lea.vmem %s52_s30, 4096  ;;  %p761_p0 = scmp.lt.s32.totalorder %s52_s30, %s52_s30 }
  0x3c   :  { %p757_p13 = scmp.ne.s32.totalorder %s52_s30, %s756_s13  ;;  %p762_p1 = scmp.lt.s32.totalorder %s756_s13, %s756_s13 }
  0x3e   :  { %p763_p2 = por %p762_p1, %p761_p0 }
  0x40   :  { %p764_p3 = pnand %p763_p2, %p757_p13 }
  0x42   :  { %767 = shalt.err (!%p764_p3)
}
  0x43   :  { %57 = dma.hbm_to_vmem [thread:$0]  %s956_s3, 4096, %s52_s30, [#allocation11], %s801_s0, %s801_s0, %s802_s21  }
  0x44   :  { %790 = dma.done.wait [#allocation5], 128  }
  0x45   :  { %791 = vsyncadd [#allocation5], 4294967168 }
  0x46   :  { %792 = dma.done.wait [#allocation8], 2176  }
  0x47   :  { %793 = vsyncadd [#allocation8], 4294965120 }
  0x48   :  { %794 = dma.done.wait [#allocation11], 4096  }
  0x49   :  { %795 = vsyncadd [#allocation11], 4294963200  ;;  %v804_v0 = vmov 0.0|0.0   ;;  %vm805_vm0 = vmmov 0   ;;  %v806_v1 = vmov 0.0   ;;  %v807_v2 = vmov 2  }
  0x4a   :  { %589 = vmatprep.subr.bf16.mxu0 %v804_v0  ;;  %516 = vmatprep.mubr.msk.f32.mxu0 %vm805_vm0, %v806_v1  ;;  %v808_v3 = vmov 0   ;;  %v79_v4 = vld [vmem:[#allocation9] sm:$0xff]  ;;  %v80_v5 = vld [vmem:[#allocation9 + $0x8] sm:$0xff]  ;;  %v81_v6 = vld [vmem:[#allocation9 + $0x10] sm:$0xff]  ;;  %v809_v21 = vmov 3   ;;  %v810_v22 = vmov 1  }
  0x4b   :  { %677 = vset.pattern.permute.xlu1 %v807_v2  ;;  %675 = vset.pattern.permute.xlu0 %v808_v3  ;;  %v590_v7 = vpack.c.bf16 %v80_v5, %v79_v4  ;;  %v82_v8 = vld [vmem:[#allocation9 + $0x18] sm:$0xff]  ;;  %v83_v10 = vld [vmem:[#allocation9 + $0x20] sm:$0xff]  ;;  %v84_v11 = vld [vmem:[#allocation9 + $0x28] sm:$0xff]  ;;  %s811_s21 = smov [#allocation12]  }
  0x4c   :  { %613 = vmatprep.subr.bf16.mxu1 %v804_v0  ;;  %551 = vmatprep.mubr.msk.f32.mxu1 %vm805_vm0, %v806_v1  ;;  %v593_v9 = vpack.c.bf16 %v82_v8, %v81_v6  ;;  %v171_v12 = vld [vmem:[#allocation7] sm:$0xff]  ;;  %v246_v13 = vld [vmem:[#allocation10 + $0x80] sm:$0xff]  ;;  %v247_v14 = vld [vmem:[#allocation10 + $0x88] sm:$0xff]  ;;  %v596_v15 = vpack.c.bf16 %v84_v11, %v83_v10  ;;  %s414_s27 = sshll.u32 %s811_s21, 4  ;;  %s415_s27 = int_to_ptr.vmem [resolvable:$true] %s414_s27 }
  0x4d   :  { %591 = vmatpush3.bf16.msra.mxu0 %v590_v7  ;;  %196 = vperm.xlu1 %677, %v171_v12   ;;  %v614_v16 = vpack.c.bf16 %v247_v14, %v246_v13  ;;  %v248_v17 = vld [vmem:[#allocation10 + $0x90] sm:$0xff]  ;;  %v249_v18 = vld [vmem:[#allocation10 + $0x98] sm:$0xff]  ;;  %v250_v25 = vld [vmem:[#allocation10 + $0xa0] sm:$0xff]  ;;  %s768_s28 = scalar_lea.vmem %s415_s27, 128  ;;  %p773_p5 = scmp.lt.s32.totalorder %s415_s27, %s415_s27 }
  0x4e   :  { %592 = vmatprep.subr.bf16.mxu0 %v804_v0  ;;  %175 = vperm.xlu0 %675, %v171_v12   ;;  %v85_v19 = vld [vmem:[#allocation9 + $0x30] sm:$0xff]  ;;  %v86_v20 = vld [vmem:[#allocation9 + $0x38] sm:$0xff]  ;;  %v617_v23 = vpack.c.bf16 %v249_v18, %v248_v17  ;;  %v251_v26 = vld [vmem:[#allocation10 + $0xa8] sm:$0xff]  ;;  %p769_p4 = scmp.ne.s32.totalorder %s415_s27, %s768_s28  ;;  %p774_p6 = scmp.lt.s32.totalorder %s768_s28, %s768_s28 }
  0x4f   :  { %615 = vmatpush3.bf16.msra.mxu1 %v614_v16  ;;  %v599_v24 = vpack.c.bf16 %v86_v20, %v85_v19  ;;  %v87_v27 = vld [vmem:[#allocation9 + $0x40] sm:$0xff]  ;;  %v88_v28 = vld [vmem:[#allocation9 + $0x48] sm:$0xff]  ;;  %v620_v29 = vpack.c.bf16 %v251_v26, %v250_v25  ;;  %v252_v31 = vld [vmem:[#allocation10 + $0xb0] sm:$0xff] }
  0x50   :  { %616 = vmatprep.subr.bf16.mxu1 %v804_v0  ;;  %v602_v30 = vpack.c.bf16 %v88_v28, %v87_v27  ;;  %v253_v32 = vld [vmem:[#allocation10 + $0xb8] sm:$0xff]  ;;  %v89_v33 = vld [vmem:[#allocation9 + $0x50] sm:$0xff]  ;;  %v254_v37 = vld [vmem:[#allocation10 + $0xc0] sm:$0xff]  ;;  %p775_p7 = por %p774_p6, %p773_p5 }
  0x51   :  { %594 = vmatpush3.bf16.msra.mxu0 %v593_v9  ;;  %678 = vset.pattern.permute.xlu1 %v809_v21  ;;  %v90_v34 = vld [vmem:[#allocation9 + $0x58] sm:$0xff]  ;;  %v623_v35 = vpack.c.bf16 %v253_v32, %v252_v31  ;;  %v255_v38 = vld [vmem:[#allocation10 + $0xc8] sm:$0xff]  ;;  %v91_v39 = vld [vmem:[#allocation9 + $0x60] sm:$0xff] }
  0x52   :  { %595 = vmatprep.subr.bf16.mxu0 %v804_v0  ;;  %676 = vset.pattern.permute.xlu0 %v810_v22  ;;  %v605_v36 = vpack.c.bf16 %v90_v34, %v89_v33  ;;  %v92_v40 = vld [vmem:[#allocation9 + $0x68] sm:$0xff]  ;;  %v626_v41 = vpack.c.bf16 %v255_v38, %v254_v37  ;;  %v256_v43 = vld [vmem:[#allocation10 + $0xd0] sm:$0xff]  ;;  %v257_v44 = vld [vmem:[#allocation10 + $0xd8] sm:$0xff]  ;;  %p776_p8 = pnand %p775_p7, %p769_p4 }
  0x53   :  { %206 = vperm.xlu1 %678, %v171_v12   ;;  %185 = vperm.xlu0 %676, %v171_v12   ;;  %v608_v42 = vpack.c.bf16 %v92_v40, %v91_v39  ;;  %v93_v45 = vld [vmem:[#allocation9 + $0x70] sm:$0xff]  ;;  %v94_v46 = vld [vmem:[#allocation9 + $0x78] sm:$0xff]  ;;  %v629_v47 = vpack.c.bf16 %v257_v44, %v256_v43  ;;  %v258_v49 = vld [vmem:[#allocation10 + $0xe0] sm:$0xff] }
  0x54   :  { %618 = vmatpush3.bf16.msra.mxu1 %v617_v23  ;;  %v611_v48 = vpack.c.bf16 %v94_v46, %v93_v45  ;;  %v259_v50 = vld [vmem:[#allocation10 + $0xe8] sm:$0xff]  ;;  %v229_v51 = vld [vmem:[#allocation10] sm:$0xff]  ;;  %v78_v54 = vld [vmem:[#allocation4] sm:$0xff] }
  0x55   :  { %597 = vmatpush3.bf16.msra.mxu0 %v596_v15  ;;  %619 = vmatprep.subr.bf16.mxu1 %v804_v0  ;;  %v230_v52 = vld [vmem:[#allocation10 + $0x8] sm:$0xff]  ;;  %v632_v53 = vpack.c.bf16 %v259_v50, %v258_v49  ;;  %v260_v56 = vld [vmem:[#allocation10 + $0xf0] sm:$0xff]  ;;  %v261_v57 = vld [vmem:[#allocation10 + $0xf8] sm:$0xff] }
  0x56   :  { %598 = vmatprep.subr.bf16.mxu0 %v804_v0  ;;  %v638_v55 = vpack.c.bf16 %v230_v52, %v229_v51  ;;  %v231_v58 = vld [vmem:[#allocation10 + $0x10] sm:$0xff]  ;;  %v232_v59 = vld [vmem:[#allocation10 + $0x18] sm:$0xff]  ;;  %v635_v60 = vpack.c.bf16 %v261_v57, %v260_v56  ;;  %v233_v62 = vld [vmem:[#allocation10 + $0x20] sm:$0xff] }
  0x57   :  { %679 = vset.pattern.permute.xlu0 %v809_v21  ;;  %v641_v61 = vpack.c.bf16 %v232_v59, %v231_v58  ;;  %v234_v63 = vld [vmem:[#allocation10 + $0x28] sm:$0xff]  ;;  %v235_v3 = vld [vmem:[#allocation10 + $0x30] sm:$0xff]  ;;  %v236_v4 = vld [vmem:[#allocation10 + $0x38] sm:$0xff] }
  0x58   :  { %621 = vmatpush3.bf16.msra.mxu1 %v620_v29  ;;  %v644_v2 = vpack.c.bf16 %v234_v63, %v233_v62  ;;  %v647_v5 = vpack.c.bf16 %v236_v4, %v235_v3  ;;  %v237_v6 = vld [vmem:[#allocation10 + $0x40] sm:$0xff]  ;;  %v238_v7 = vld [vmem:[#allocation10 + $0x48] sm:$0xff]  ;;  %v239_v9 = vld [vmem:[#allocation10 + $0x50] sm:$0xff] }
  0x59   :  { %600 = vmatpush3.bf16.msra.mxu0 %v599_v24  ;;  %622 = vmatprep.subr.bf16.mxu1 %v804_v0  ;;  %v650_v8 = vpack.c.bf16 %v238_v7, %v237_v6  ;;  %v240_v10 = vld [vmem:[#allocation10 + $0x58] sm:$0xff]  ;;  %v241_v11 = vld [vmem:[#allocation10 + $0x60] sm:$0xff]  ;;  %v242_v12 = vld [vmem:[#allocation10 + $0x68] sm:$0xff] }
  0x5a   :  { %601 = vmatprep.subr.bf16.mxu0 %v804_v0  ;;  %v656_v13 = vpack.c.bf16 %v242_v12, %v241_v11  ;;  %v243_v14 = vld [vmem:[#allocation10 + $0x70] sm:$0xff]  ;;  %v244_v15 = vld [vmem:[#allocation10 + $0x78] sm:$0xff] }
  0x5b   :  { %v659_v16 = vpack.c.bf16 %v244_v15, %v243_v14  ;;  %v429_v19 = vld [vmem:[%s957_s4 + $0x2] ss:$0 sm:$0xff]  ;;  %v427_v20 = vld [vmem:[%s957_s4] ss:$0 sm:$0xff]  ;;  %v430_v21 = vld [vmem:[%s957_s4 + $0x3] ss:$0 sm:$0xff] }
  0x5c   :  { %624 = vmatpush3.bf16.msra.mxu1 %v623_v35  ;;  %v426_v34 = vld [vmem:[%s957_s4 + $0x4] ss:$0 sm:$0xff] }
  0x5d   :  { %603 = vmatpush3.bf16.msra.mxu0 %v602_v30  ;;  %625 = vmatprep.subr.bf16.mxu1 %v804_v0  ;;  %v431_v30 = vld [vmem:[%s957_s4 + $0x5] ss:$0 sm:$0xff] }
  0x5e   :  { %604 = vmatprep.subr.bf16.mxu0 %v804_v0 }
  0x60   :  { %627 = vmatpush3.bf16.msra.mxu1 %v626_v41  ;;  %v432_v41 = vld [vmem:[%s957_s4 + $0x6] ss:$0 sm:$0xff] }
  0x61   :  { %606 = vmatpush3.bf16.msra.mxu0 %v605_v36  ;;  %628 = vmatprep.subr.bf16.mxu1 %v804_v0 }
  0x62   :  { %607 = vmatprep.subr.bf16.mxu0 %v804_v0 }
  0x64   :  { %630 = vmatpush3.bf16.msra.mxu1 %v629_v47 }
  0x65   :  { %609 = vmatpush3.bf16.msra.mxu0 %v608_v42  ;;  %631 = vmatprep.subr.bf16.mxu1 %v804_v0 }
  0x66   :  { %610 = vmatprep.subr.bf16.mxu0 %v804_v0 }
  0x68   :  { %633 = vmatpush3.bf16.msra.mxu1 %v632_v53 }
  0x69   :  { %612 = vmatpush3.bf16.msra.mxu0 %v611_v48  ;;  %634 = vmatprep.subr.bf16.mxu1 %v804_v0 }
  0x6a   :  { %637 = vmatprep.subr.bf16.mxu0 %v804_v0 }
  0x6c   :  { %517 = vmatmul.mubr.f32.vlgmr.msra.gmra.mrb[0].mxu0 %v78_v54  ;;  %636 = vmatpush3.bf16.msra.mxu1 %v635_v60 }
  0x6d   :  { %639 = vmatpush3.bf16.msra.mxu0 %v638_v55  ;;  %586 = vmatprep.mubr.msk.f32.mxu0 %vm805_vm0, %v806_v1  ;;  %v653_v1 = vpack.c.bf16 %v240_v10, %v239_v9 }
  0x6e   :  { %640 = vmatprep.subr.bf16.mxu0 %v804_v0 }
  0x71   :  { %642 = vmatpush3.bf16.msra.mxu0 %v641_v61 }
  0x72   :  { %643 = vmatprep.subr.bf16.mxu0 %v804_v0 }
  0x75   :  { %645 = vmatpush3.bf16.msra.mxu0 %v644_v2 }
  0x76   :  { %646 = vmatprep.subr.bf16.mxu0 %v804_v0 }
  0x79   :  { %648 = vmatpush3.bf16.msra.mxu0 %v647_v5 }
  0x7a   :  { %649 = vmatprep.subr.bf16.mxu0 %v804_v0 }
  0x7d   :  { %651 = vmatpush3.bf16.msra.mxu0 %v650_v8 }
  0x7e   :  { %652 = vmatprep.subr.bf16.mxu0 %v804_v0 }
  0x81   :  { %654 = vmatpush3.bf16.msra.mxu0 %v653_v1 }
  0x82   :  { %655 = vmatprep.subr.bf16.mxu0 %v804_v0 }
  0x85   :  { %657 = vmatpush3.bf16.msra.mxu0 %v656_v13 }
  0x86   :  { %658 = vmatprep.subr.bf16.mxu0 %v804_v0  ;;  %v428_v0 = vld [vmem:[%s957_s4 + $0x1] ss:$0 sm:$0xff] }
  0x89   :  { %660 = vmatpush3.bf16.msra.mxu0 %v659_v16 }
  0xcc   :  { %v197_v17 = vpop.permute.xlu1 %196 }
  0xcd   :  { %v176_v18 = vpop.permute.xlu0 %175  ;;  %v203_v22 = vmul.f32 %v429_v19, %v197_v17 }
  0xce   :  { %v182_v23 = vmul.f32 %v427_v20, %v176_v18 }
  0xd2   :  { %v207_v24 = vpop.permute.xlu1 %206  ;;  %v186_v26 = vpop.permute.xlu0 %185 }
  0xd3   :  { %v213_v25 = vmul.f32 %v430_v21, %v207_v24  ;;  %v192_v27 = vmul.f32 %v428_v0, %v186_v26 }
  0xd5   :  { %v214_v28 = vadd.f32 %v213_v25, %v203_v22  ;;  %v193_v29 = vadd.f32 %v192_v27, %v182_v23 }
  0xd7   :  { %v215_v31 = vadd.f32 %v214_v28, %v193_v29 }
  0xd9   :  { %v220_v32 = vadd.f32 %v431_v30, %v215_v31 }
  0xdb   :  { %v221_v33 = vmax.f32 %v220_v32, 0.0 }
  0xdd   :  { %552 = vmatmul.mubr.f32.vlgmr.msra.gmra.mrb[0].mxu1 %v221_v33 }
 0x13f   :  { %v165_v35 = vpop.f32.mrb[0].mxu0 }
 0x140   :  { %v166_v36 = vadd.f32 %v426_v34, %v165_v35  ;;  %v518_v37 = vpop.f32.mrb[1].mxu0 }
 0x142   :  { %v169_v38 = vmax.f32 %v166_v36, 0.0 }
 0x144   :  { %587 = vmatmul.mubr.f32.vlgmr.msra.gmra.mrb[2].mxu0 %v169_v38 }
 0x1b0   :  { %v328_v39 = vpop.f32.mrb[0].mxu1 }
 0x1b1   :  { %v553_v40 = vpop.f32.mrb[1].mxu1 }
 0x217   :  { %v398_v42 = vpop.f32.mrb[2].mxu0 }
 0x218   :  { %v399_v43 = vadd.f32 %v398_v42, %v328_v39  ;;  %v588_v44 = vpop.f32.mrb[3].mxu0 }
 0x21a   :  { %v406_v45 = vadd.f32 %v432_v41, %v399_v43 }
 0x21c   :  { %407 = vst [vmem:[#allocation12] sm:$0xff] %v406_v45 }
 0x21d   :  { %779 = shalt.err (!%p776_p8)
}
 0x21e   :  { %s780_s6 = scalar_lea.hbm %s958_s5, 128 }
 0x21f   :  { %p781_p9 = scmp.ne.s32.totalorder %s958_s5, %s780_s6  ;;  %p784_p10 = scmp.lt.u32.totalorder %s780_s6, %s958_s5 }
 0x221   :  { %p786_p11 = pnand %p784_p10, %p781_p9 }
 0x223   :  { %789 = shalt.err (!%p786_p11)
}
 0x224   :  { %417 = dma.vmem_to_hbm [thread:$0]  %s415_s27, 128, %s958_s5, [#allocation6]  }
 0x225   :  { %796 = dma.done.wait [#allocation6], 128  }
 0x226   :  { %797 = vsyncadd [#allocation6], 4294967168 }
 0x227   :  { %421 = vsyncpa [#allocation5], 1 }
 0x228   :  { %422 = vsyncpa [#allocation8], 1 }
 0x229   :  { %423 = vsyncpa [#allocation11], 1 }
 0x22a   :  { %424 = vsyncpa [#allocation6], 1 }

</bundles_post_ra>
